<compile_context>
chip_gen: v7x
topology: tpu7x:2x2x1
jax: 0.10.0
libtpu: 0.0.40
codegen_flags: <defaults>
</compile_context>

<pallas_src>
import functools

import jax
import jax.numpy as jnp
from jax import lax
from jax.experimental import pallas as pl
from jax.experimental.pallas import tpu as pltpu


def _interaction_kernel(w_ref, eq_ref, ep_ref, m1r_ref, m1c_ref, m2c_ref,
                        gpq_ref, gqp_ref):
    f32 = jnp.float32
    Eq = eq_ref[0].astype(f32)            # [TQ, H]   (TQ = TB*Sq)
    Ep = ep_ref[0].astype(f32)            # [TP, H]   (TP = TB*Sp)
    m1_row = m1r_ref[0]                   # [1, TQ]   element-id coded (0 = masked)
    m1_col = m1c_ref[0]                   # [TQ, 1]
    m2_col = m2c_ref[0]                   # [TP, 1]
    w_q = w_ref[0:1, :].astype(f32)       # [1, H]
    w_p = w_ref[1:2, :].astype(f32)       # [1, H]
    w_qp = w_ref[2:3, :].astype(f32)      # [1, H]
    H = Eq.shape[1]

    # Block-diagonal joint mask: same element AND both positions valid.
    valid = (m2_col == m1_row) & (m2_col > 0.0)       # [TP, TQ] bool
    maskf = valid.astype(f32)

    # U[p, q] = <w_q, Eq[q]> + <w_p, Ep[p]> + <w_qp, Eq[q]*Ep[p]>
    #         = <w_q + w_qp*Ep[p], Eq[q]> + <w_p, Ep[p]>
    lhs = Ep * w_qp + w_q                                          # [TP, H]
    U = lax.dot_general(lhs, Eq, (((1,), (1,)), ((), ())),
                        preferred_element_type=f32)                # [TP, TQ]
    U = U + jnp.sum(Ep * w_p, axis=-1, keepdims=True)              # + up_col

    NEG = jnp.float32(-1e30)
    Um = jnp.where(valid, U, NEG)

    # A_p = softmax over q (axis 1); B_p = softmax over p (axis 0).
    # Masked positions zeroed (matches torch masked_fill(..., 0)); fully-masked
    # rows/cols come out all-zero (matches the final torch values).
    mx_q = jnp.max(Um, axis=1, keepdims=True)
    e_q = jnp.exp(Um - mx_q) * maskf
    s_q = jnp.sum(e_q, axis=1, keepdims=True)
    A_p = e_q / jnp.where(s_q == 0.0, 1.0, s_q)                    # [TP, TQ]

    mx_p = jnp.max(Um, axis=0, keepdims=True)
    e_p = jnp.exp(Um - mx_p) * maskf
    s_p = jnp.sum(e_p, axis=0, keepdims=True)
    B_p = e_p / jnp.where(s_p == 0.0, 1.0, s_p)                    # [TP, TQ]

    A1 = jnp.dot(A_p, Eq, preferred_element_type=f32)              # A''_p  [TP, H]
    B1 = lax.dot_general(B_p, Ep, (((0,), (0,)), ((), ())),
                         preferred_element_type=f32)               # B''_p  [TQ, H]
    A2 = jnp.dot(A_p, B1, preferred_element_type=f32)              # A'''_p [TP, H]
    B2 = lax.dot_general(B_p, A1, (((0,), (0,)), ((), ())),
                         preferred_element_type=f32)               # B'''_p [TQ, H]

    # Per-row validity (only the plain Eq / Ep slices need explicit masking:
    # B1/B2/A1/A2 are already zero on masked rows/cols by construction).
    m1v = (m1_col > 0.0).astype(f32)                               # [TQ, 1]
    m2v = (m2_col > 0.0).astype(f32)                               # [TP, 1]

    odt = gpq_ref.dtype
    # G_p_q = [Eq, B1, B2, Eq*B1, Eq*B2] * mask1  — direct slice stores.
    gpq_ref[0, :, 0:H]       = (Eq * m1v).astype(odt)
    gpq_ref[0, :, H:2 * H]   = B1.astype(odt)
    gpq_ref[0, :, 2 * H:3 * H] = B2.astype(odt)
    gpq_ref[0, :, 3 * H:4 * H] = (Eq * B1).astype(odt)
    gpq_ref[0, :, 4 * H:5 * H] = (Eq * B2).astype(odt)
    # G_q_p = [Ep, A1, A2, Ep*A1, Ep*A2] * mask2
    gqp_ref[0, :, 0:H]       = (Ep * m2v).astype(odt)
    gqp_ref[0, :, H:2 * H]   = A1.astype(odt)
    gqp_ref[0, :, 2 * H:3 * H] = A2.astype(odt)
    gqp_ref[0, :, 3 * H:4 * H] = (Ep * A1).astype(odt)
    gqp_ref[0, :, 4 * H:5 * H] = (Ep * A2).astype(odt)


@jax.jit
def interaction_pallas(encode_input1, encode_input2, input1_mask, input2_mask, w):
    B, num_q, Sq, H = encode_input1.shape
    _, num_p, Sp, _ = encode_input2.shape

    if num_q == num_p:
        E_q = encode_input1.reshape(-1, Sq, H)
        m1 = input1_mask.reshape(-1, Sq)
    else:
        assert num_q == 1
        E_q = jnp.broadcast_to(encode_input1,
                               (B, num_p, Sq, H)).reshape(-1, Sq, H)
        m1 = jnp.broadcast_to(input1_mask, (B, num_p, Sq)).reshape(-1, Sq)
    E_p = encode_input2.reshape(-1, Sp, H)
    m2 = input2_mask.reshape(-1, Sp)
    BN = B * num_p

    # --- choose batch-per-grid-step (TB): fill ~128-256 MXU lanes, keep
    # the grid length >= 2 when possible (dual-TC v7x), pad BN up to TB*G.
    tb = max(1, min(BN, max(1, 256 // max(Sq, Sp))))
    if BN >= 2 and -(-BN // tb) < 2:
        tb = -(-BN // 2)
    G = -(-BN // tb)
    BNp = G * tb
    if BNp != BN:
        pad = BNp - BN
        E_q = jnp.pad(E_q, ((0, pad), (0, 0), (0, 0)))
        E_p = jnp.pad(E_p, ((0, pad), (0, 0), (0, 0)))
        m1 = jnp.pad(m1, ((0, pad), (0, 0)))
        m2 = jnp.pad(m2, ((0, pad), (0, 0)))

    TQ, TP = tb * Sq, tb * Sp

    # Element-ID coded masks: value = (global_element_index + 1) where valid, 0 elsewhere.
    eid = (jnp.arange(BNp, dtype=jnp.float32) + 1.0)[:, None]
    m1_id = m1.astype(jnp.float32) * eid                 # [BNp, Sq]
    m2_id = m2.astype(jnp.float32) * eid                 # [BNp, Sp]

    m1_row = m1_id.reshape(G, 1, TQ)
    m1_col = m1_id.reshape(G, TQ, 1)
    m2_col = m2_id.reshape(G, TP, 1)
    Eq_b = E_q.reshape(G, TQ, H)
    Ep_b = E_p.reshape(G, TP, H)
    w3h = w.reshape(3, H)                                # rows: w_q, w_p, w_qp

    out_dtype = encode_input1.dtype
    gpq, gqp = pl.pallas_call(
        _interaction_kernel,
        out_shape=(jax.ShapeDtypeStruct((G, TQ, 5 * H), out_dtype),
                   jax.ShapeDtypeStruct((G, TP, 5 * H), out_dtype)),
        grid_spec=pltpu.PrefetchScalarGridSpec(
            num_scalar_prefetch=0,
            grid=(G,),
            in_specs=[
                pl.BlockSpec((3, H), lambda b: (0, 0)),
                pl.BlockSpec((1, TQ, H), lambda b: (b, 0, 0)),
                pl.BlockSpec((1, TP, H), lambda b: (b, 0, 0)),
                pl.BlockSpec((1, 1, TQ), lambda b: (b, 0, 0)),
                pl.BlockSpec((1, TQ, 1), lambda b: (b, 0, 0)),
                pl.BlockSpec((1, TP, 1), lambda b: (b, 0, 0)),
            ],
            out_specs=[
                pl.BlockSpec((1, TQ, 5 * H), lambda b: (b, 0, 0)),
                pl.BlockSpec((1, TP, 5 * H), lambda b: (b, 0, 0)),
            ],
        ),
        compiler_params=pltpu.CompilerParams(
            dimension_semantics=("parallel",)),
    )(w3h, Eq_b, Ep_b, m1_row, m1_col, m2_col)

    G_p_q = gpq.reshape(BNp, Sq, 5 * H)[:BN].reshape(B, num_p, Sq, 5 * H)
    G_q_p = gqp.reshape(BNp, Sp, 5 * H)[:BN].reshape(B, num_p, Sp, 5 * H)
    if num_q != num_p:
        G_p_q = jnp.max(G_p_q, axis=1, keepdims=True)
    return G_p_q, G_q_p


def interaction_reference(enc1, enc2, mask1, mask2, w):
    """Pure-JAX mirror of the PyTorch forward (safe softmax => same final values)."""
    B, num_q, Sq, H = enc1.shape
    _, num_p, Sp, _ = enc2.shape
    if num_q == num_p:
        E_q = enc1.reshape(-1, Sq, H)
        m1 = mask1.reshape(-1, Sq).astype(jnp.float32)
    else:
        E_q = jnp.broadcast_to(enc1, (B, num_p, Sq, H)).reshape(-1, Sq, H)
        m1 = jnp.broadcast_to(mask1, (B, num_p, Sq)).reshape(-1, Sq).astype(jnp.float32)
    E_p = enc2.reshape(-1, Sp, H)
    m2 = mask2.reshape(-1, Sp).astype(jnp.float32)

    Eq_t = jnp.broadcast_to(E_q[:, None, :, :], (E_q.shape[0], Sp, Sq, H))
    Ep_t = jnp.broadcast_to(E_p[:, :, None, :], (E_p.shape[0], Sp, Sq, H))
    E = jnp.concatenate([Eq_t, Ep_t, Eq_t * Ep_t], axis=-1)
    U = jnp.einsum('bpqc,c->bpq', E, w.reshape(-1))

    mask = m2[:, :, None] * m1[:, None, :]
    Um = jnp.where(mask > 0, U, -1e30)

    def safe_softmax(x, axis):
        mx = jnp.max(x, axis=axis, keepdims=True)
        e = jnp.exp(x - mx) * mask
        s = jnp.sum(e, axis=axis, keepdims=True)
        return e / jnp.where(s == 0.0, 1.0, s)

    A_p = safe_softmax(Um, 2)
    B_p = safe_softmax(Um, 1)

    A1 = jnp.einsum('bpq,bqh->bph', A_p, E_q)
    B1 = jnp.einsum('bpq,bph->bqh', B_p, E_p)
    A2 = jnp.einsum('bpq,bqh->bph', A_p, B1)
    B2 = jnp.einsum('bpq,bph->bqh', B_p, A1)

    G_q_p = jnp.concatenate([E_p, A1, A2, E_p * A1, E_p * A2], axis=-1)
    G_p_q = jnp.concatenate([E_q, B1, B2, E_q * B1, E_q * B2], axis=-1)
    G_p_q = G_p_q * m1[:, :, None]
    G_q_p = G_q_p * m2[:, :, None]

    G_p_q = G_p_q.reshape(B, num_p, Sq, 5 * H)
    G_q_p = G_q_p.reshape(B, num_p, Sp, 5 * H)
    if num_q != num_p:
        G_p_q = jnp.max(G_p_q, axis=1, keepdims=True)
    return G_p_q, G_q_p


if __name__ == "__main__":
    key = jax.random.PRNGKey(0)
    B, num, Sq, Sp, H = 2, 2, 8, 16, 128
    k1, k2, k3, k4, k5, k6 = jax.random.split(key, 6)

    enc1 = jax.random.normal(k1, (B, num, Sq, H), jnp.float32)
    enc2 = jax.random.normal(k2, (B, num, Sp, H), jnp.float32)
    len1 = jax.random.randint(k3, (B, num), 1, Sq + 1)
    len2 = jax.random.randint(k4, (B, num), 1, Sp + 1)
    mask1 = (jnp.arange(Sq)[None, None, :] < len1[..., None]).astype(jnp.int32)
    mask2 = (jnp.arange(Sp)[None, None, :] < len2[..., None]).astype(jnp.int32)
    # nn.Linear(3*H, 1, bias=False).weight has shape [1, 3*H]
    w = jax.random.normal(k5, (1, 3 * H), jnp.float32) * 0.1

    # Case 1: num_q == num_p
    G_p_q, G_q_p = interaction_pallas(enc1, enc2, mask1, mask2, w)
    jax.block_until_ready((G_p_q, G_q_p))
    ref_pq, ref_qp = interaction_reference(enc1, enc2, mask1, mask2, w)
    assert G_p_q.shape == (B, num, Sq, 5 * H)
    assert G_q_p.shape == (B, num, Sp, 5 * H)
    assert jnp.allclose(G_p_q, ref_pq, atol=1e-4, rtol=1e-4)
    assert jnp.allclose(G_q_p, ref_qp, atol=1e-4, rtol=1e-4)

    # Case 2: num_q == 1 != num_p (expand + max-pool over num dim)
    enc1b, mask1b = enc1[:, :1], mask1[:, :1]
    G2_pq, G2_qp = interaction_pallas(enc1b, enc2, mask1b, mask2, w)
    jax.block_until_ready((G2_pq, G2_qp))
    ref2_pq, ref2_qp = interaction_reference(enc1b, enc2, mask1b, mask2, w)
    assert G2_pq.shape == (B, 1, Sq, 5 * H)
    assert jnp.allclose(G2_pq, ref2_pq, atol=1e-4, rtol=1e-4)
    assert jnp.allclose(G2_qp, ref2_qp, atol=1e-4, rtol=1e-4)

    # Case 3: larger batch => multi-step grid + BN padding path
    B3, num3 = 5, 4
    k7, k8, k9, k10 = jax.random.split(k6, 4)
    enc1c = jax.random.normal(k7, (B3, num3, Sq, H), jnp.float32)
    enc2c = jax.random.normal(k8, (B3, num3, Sp, H), jnp.float32)
    len1c = jax.random.randint(k9, (B3, num3), 1, Sq + 1)
    len2c = jax.random.randint(k10, (B3, num3), 1, Sp + 1)
    mask1c = (jnp.arange(Sq)[None, None, :] < len1c[..., None]).astype(jnp.int32)
    mask2c = (jnp.arange(Sp)[None, None, :] < len2c[..., None]).astype(jnp.int32)
    G3_pq, G3_qp = interaction_pallas(enc1c, enc2c, mask1c, mask2c, w)
    jax.block_until_ready((G3_pq, G3_qp))
    ref3_pq, ref3_qp = interaction_reference(enc1c, enc2c, mask1c, mask2c, w)
    assert jnp.allclose(G3_pq, ref3_pq, atol=1e-4, rtol=1e-4)
    assert jnp.allclose(G3_qp, ref3_qp, atol=1e-4, rtol=1e-4)

    print("KERNEL_OK")
</pallas_src>

<mosaic_0001>
module attributes {stable_mosaic.version = 11 : i64} {
  func.func @_interaction_kernel(%arg0: i32, %arg1: memref<3x128xf32, #tpu.memory_space<vmem>>, %arg2: memref<1x16x128xf32, #tpu.memory_space<vmem>>, %arg3: memref<1x32x128xf32, #tpu.memory_space<vmem>>, %arg4: memref<1x1x16xf32, #tpu.memory_space<vmem>>, %arg5: memref<1x16x1xf32, #tpu.memory_space<vmem>>, %arg6: memref<1x32x1xf32, #tpu.memory_space<vmem>>, %arg7: memref<1x16x640xf32, #tpu.memory_space<vmem>>, %arg8: memref<1x32x640xf32, #tpu.memory_space<vmem>>) attributes {dimension_semantics = [#tpu.dimension_semantics<parallel>], iteration_bounds = array<i64: 2>, scalar_prefetch = 0 : i64, scratch_operands = 0 : i64, tpu.core_type = #tpu.core_type<tc>, window_params = [{pipeline_mode = #tpu.pipeline_mode<synchronous>, transform_indices = @transform_0, window_bounds = array<i64: 3, 128>}, {transform_indices = @transform_1, window_bounds = array<i64: 1, 16, 128>}, {transform_indices = @transform_2, window_bounds = array<i64: 1, 32, 128>}, {transform_indices = @transform_3, window_bounds = array<i64: 1, 1, 16>}, {transform_indices = @transform_4, window_bounds = array<i64: 1, 16, 1>}, {transform_indices = @transform_5, window_bounds = array<i64: 1, 32, 1>}, {transform_indices = @transform_6, window_bounds = array<i64: 1, 16, 640>}, {transform_indices = @transform_7, window_bounds = array<i64: 1, 32, 640>}]} {
    %c0 = arith.constant 0 : index
    %c0_0 = arith.constant 0 : index
    %c0_1 = arith.constant 0 : index
    %0 = vector.load %arg2[%c0, %c0_0, %c0_1] : memref<1x16x128xf32, #tpu.memory_space<vmem>>, vector<1x16x128xf32>
    %1 = vector.shape_cast %0 : vector<1x16x128xf32> to vector<16x128xf32>
    %c0_2 = arith.constant 0 : index
    %c0_3 = arith.constant 0 : index
    %c0_4 = arith.constant 0 : index
    %2 = vector.load %arg3[%c0_2, %c0_3, %c0_4] : memref<1x32x128xf32, #tpu.memory_space<vmem>>, vector<1x32x128xf32>
    %3 = vector.shape_cast %2 : vector<1x32x128xf32> to vector<32x128xf32>
    %c0_5 = arith.constant 0 : index
    %c0_6 = arith.constant 0 : index
    %c0_7 = arith.constant 0 : index
    %4 = vector.load %arg4[%c0_5, %c0_6, %c0_7] : memref<1x1x16xf32, #tpu.memory_space<vmem>>, vector<1x1x16xf32>
    %5 = vector.shape_cast %4 : vector<1x1x16xf32> to vector<1x16xf32>
    %c0_8 = arith.constant 0 : index
    %c0_9 = arith.constant 0 : index
    %c0_10 = arith.constant 0 : index
    %6 = vector.load %arg5[%c0_8, %c0_9, %c0_10] : memref<1x16x1xf32, #tpu.memory_space<vmem>>, vector<1x16x1xf32>
    %7 = vector.shape_cast %6 : vector<1x16x1xf32> to vector<16x1xf32>
    %c0_11 = arith.constant 0 : index
    %c0_12 = arith.constant 0 : index
    %c0_13 = arith.constant 0 : index
    %8 = vector.load %arg6[%c0_11, %c0_12, %c0_13] : memref<1x32x1xf32, #tpu.memory_space<vmem>>, vector<1x32x1xf32>
    %9 = vector.shape_cast %8 : vector<1x32x1xf32> to vector<32x1xf32>
    %c0_14 = arith.constant 0 : index
    %c0_15 = arith.constant 0 : index
    %10 = vector.load %arg1[%c0_14, %c0_15] : memref<3x128xf32, #tpu.memory_space<vmem>>, vector<1x128xf32>
    %c1 = arith.constant 1 : index
    %c0_16 = arith.constant 0 : index
    %11 = vector.load %arg1[%c1, %c0_16] : memref<3x128xf32, #tpu.memory_space<vmem>>, vector<1x128xf32>
    %c2 = arith.constant 2 : index
    %c0_17 = arith.constant 0 : index
    %12 = vector.load %arg1[%c2, %c0_17] : memref<3x128xf32, #tpu.memory_space<vmem>>, vector<1x128xf32>
    %13 = vector.broadcast %9 : vector<32x1xf32> to vector<32x16xf32>
    %14 = vector.broadcast %5 : vector<1x16xf32> to vector<32x16xf32>
    %15 = arith.cmpf oeq, %13, %14 : vector<32x16xf32>
    %cst = arith.constant 0.000000e+00 : f32
    %16 = vector.broadcast %cst : f32 to vector<32x1xf32>
    %17 = arith.cmpf ogt, %9, %16 : vector<32x1xf32>
    %18 = vector.broadcast %17 : vector<32x1xi1> to vector<32x16xi1>
    %19 = arith.andi %15, %18 : vector<32x16xi1>
    %20 = arith.extui %19 : vector<32x16xi1> to vector<32x16xi32>
    %21 = arith.sitofp %20 : vector<32x16xi32> to vector<32x16xf32>
    %22 = vector.broadcast %12 : vector<1x128xf32> to vector<32x128xf32>
    %23 = arith.mulf %3, %22 : vector<32x128xf32>
    %24 = vector.broadcast %10 : vector<1x128xf32> to vector<32x128xf32>
    %25 = arith.addf %23, %24 : vector<32x128xf32>
    %cst_18 = arith.constant dense<0.000000e+00> : vector<32x16xf32>
    %26 = tpu.matmul %25, %1, %cst_18 {dimension_numbers = #tpu.dot_dimension_numbers<[1], [1], [0], [0], [0, 0, 1, 0], [], []>} : vector<32x128xf32>, vector<16x128xf32>, vector<32x16xf32> -> vector<32x16xf32>
    %27 = vector.broadcast %11 : vector<1x128xf32> to vector<32x128xf32>
    %28 = arith.mulf %3, %27 : vector<32x128xf32>
    %cst_19 = arith.constant dense<0.000000e+00> : vector<32xf32>
    %29 = vector.multi_reduction <add>, %28, %cst_19 [1] : vector<32x128xf32> to vector<32xf32>
    %30 = vector.shape_cast %29 : vector<32xf32> to vector<32x1xf32>
    %31 = vector.broadcast %30 : vector<32x1xf32> to vector<32x16xf32>
    %32 = arith.addf %26, %31 : vector<32x16xf32>
    %cst_20 = arith.constant -1.000000e+30 : f32
    %33 = vector.broadcast %cst_20 : f32 to vector<32x16xf32>
    %34 = arith.select %19, %32, %33 : vector<32x16xi1>, vector<32x16xf32>
    %cst_21 = arith.constant dense<0xFF800000> : vector<32xf32>
    %35 = vector.multi_reduction <maximumf>, %34, %cst_21 [1] : vector<32x16xf32> to vector<32xf32>
    %36 = vector.shape_cast %35 : vector<32xf32> to vector<32x1xf32>
    %37 = vector.broadcast %36 : vector<32x1xf32> to vector<32x16xf32>
    %38 = arith.subf %34, %37 : vector<32x16xf32>
    %39 = math.exp %38 : vector<32x16xf32>
    %40 = arith.mulf %39, %21 : vector<32x16xf32>
    %cst_22 = arith.constant dense<0.000000e+00> : vector<32xf32>
    %41 = vector.multi_reduction <add>, %40, %cst_22 [1] : vector<32x16xf32> to vector<32xf32>
    %42 = vector.shape_cast %41 : vector<32xf32> to vector<32x1xf32>
    %cst_23 = arith.constant 0.000000e+00 : f32
    %43 = vector.broadcast %cst_23 : f32 to vector<32x1xf32>
    %44 = arith.cmpf oeq, %42, %43 : vector<32x1xf32>
    %cst_24 = arith.constant 1.000000e+00 : f32
    %45 = vector.broadcast %cst_24 : f32 to vector<32x1xf32>
    %46 = arith.select %44, %45, %42 : vector<32x1xi1>, vector<32x1xf32>
    %47 = vector.broadcast %46 : vector<32x1xf32> to vector<32x16xf32>
    %48 = arith.divf %40, %47 : vector<32x16xf32>
    %cst_25 = arith.constant dense<0xFF800000> : vector<16xf32>
    %49 = vector.multi_reduction <maximumf>, %34, %cst_25 [0] : vector<32x16xf32> to vector<16xf32>
    %50 = vector.shape_cast %49 : vector<16xf32> to vector<1x16xf32>
    %51 = vector.broadcast %50 : vector<1x16xf32> to vector<32x16xf32>
    %52 = arith.subf %34, %51 : vector<32x16xf32>
    %53 = math.exp %52 : vector<32x16xf32>
    %54 = arith.mulf %53, %21 : vector<32x16xf32>
    %cst_26 = arith.constant dense<0.000000e+00> : vector<16xf32>
    %55 = vector.multi_reduction <add>, %54, %cst_26 [0] : vector<32x16xf32> to vector<16xf32>
    %56 = vector.shape_cast %55 : vector<16xf32> to vector<1x16xf32>
    %cst_27 = arith.constant 0.000000e+00 : f32
    %57 = vector.broadcast %cst_27 : f32 to vector<1x16xf32>
    %58 = arith.cmpf oeq, %56, %57 : vector<1x16xf32>
    %cst_28 = arith.constant 1.000000e+00 : f32
    %59 = vector.broadcast %cst_28 : f32 to vector<1x16xf32>
    %60 = arith.select %58, %59, %56 : vector<1x16xi1>, vector<1x16xf32>
    %61 = vector.broadcast %60 : vector<1x16xf32> to vector<32x16xf32>
    %62 = arith.divf %54, %61 : vector<32x16xf32>
    %cst_29 = arith.constant dense<0.000000e+00> : vector<32x128xf32>
    %63 = tpu.matmul %48, %1, %cst_29 {dimension_numbers = #tpu.dot_dimension_numbers<[1], [0], [0], [1], [0, 0, 1, 1], [], []>} : vector<32x16xf32>, vector<16x128xf32>, vector<32x128xf32> -> vector<32x128xf32>
    %cst_30 = arith.constant dense<0.000000e+00> : vector<16x128xf32>
    %64 = tpu.matmul %62, %3, %cst_30 {dimension_numbers = #tpu.dot_dimension_numbers<[0], [0], [1], [1], [0, 1, 1, 1], [], []>} : vector<32x16xf32>, vector<32x128xf32>, vector<16x128xf32> -> vector<16x128xf32>
    %cst_31 = arith.constant dense<0.000000e+00> : vector<32x128xf32>
    %65 = tpu.matmul %48, %64, %cst_31 {dimension_numbers = #tpu.dot_dimension_numbers<[1], [0], [0], [1], [0, 0, 1, 1], [], []>} : vector<32x16xf32>, vector<16x128xf32>, vector<32x128xf32> -> vector<32x128xf32>
    %cst_32 = arith.constant dense<0.000000e+00> : vector<16x128xf32>
    %66 = tpu.matmul %62, %63, %cst_32 {dimension_numbers = #tpu.dot_dimension_numbers<[0], [0], [1], [1], [0, 1, 1, 1], [], []>} : vector<32x16xf32>, vector<32x128xf32>, vector<16x128xf32> -> vector<16x128xf32>
    %cst_33 = arith.constant 0.000000e+00 : f32
    %67 = vector.broadcast %cst_33 : f32 to vector<16x1xf32>
    %68 = arith.cmpf ogt, %7, %67 : vector<16x1xf32>
    %69 = arith.extui %68 : vector<16x1xi1> to vector<16x1xi32>
    %70 = arith.sitofp %69 : vector<16x1xi32> to vector<16x1xf32>
    %cst_34 = arith.constant 0.000000e+00 : f32
    %71 = vector.broadcast %cst_34 : f32 to vector<32x1xf32>
    %72 = arith.cmpf ogt, %9, %71 : vector<32x1xf32>
    %73 = arith.extui %72 : vector<32x1xi1> to vector<32x1xi32>
    %74 = arith.sitofp %73 : vector<32x1xi32> to vector<32x1xf32>
    %75 = vector.broadcast %70 : vector<16x1xf32> to vector<16x128xf32>
    %76 = arith.mulf %1, %75 : vector<16x128xf32>
    %c0_35 = arith.constant 0 : index
    %c0_36 = arith.constant 0 : index
    %c0_37 = arith.constant 0 : index
    %77 = vector.load %arg7[%c0_35, %c0_36, %c0_37] : memref<1x16x640xf32, #tpu.memory_space<vmem>>, vector<1x16x128xf32>
    %78 = vector.shape_cast %77 : vector<1x16x128xf32> to vector<16x128xf32>
    %79 = vector.shape_cast %76 : vector<16x128xf32> to vector<1x16x128xf32>
    tpu.vector_store %arg7[%c0_35, %c0_36, %c0_37], %79 {strides = array<i32>} : memref<1x16x640xf32, #tpu.memory_space<vmem>>, vector<1x16x128xf32>,
    %c0_38 = arith.constant 0 : index
    %c0_39 = arith.constant 0 : index
    %c128 = arith.constant 128 : index
    %80 = vector.load %arg7[%c0_38, %c0_39, %c128] : memref<1x16x640xf32, #tpu.memory_space<vmem>>, vector<1x16x128xf32>
    %81 = vector.shape_cast %80 : vector<1x16x128xf32> to vector<16x128xf32>
    %82 = vector.shape_cast %64 : vector<16x128xf32> to vector<1x16x128xf32>
    tpu.vector_store %arg7[%c0_38, %c0_39, %c128], %82 {strides = array<i32>} : memref<1x16x640xf32, #tpu.memory_space<vmem>>, vector<1x16x128xf32>,
    %c0_40 = arith.constant 0 : index
    %c0_41 = arith.constant 0 : index
    %c256 = arith.constant 256 : index
    %83 = vector.load %arg7[%c0_40, %c0_41, %c256] : memref<1x16x640xf32, #tpu.memory_space<vmem>>, vector<1x16x128xf32>
    %84 = vector.shape_cast %83 : vector<1x16x128xf32> to vector<16x128xf32>
    %85 = vector.shape_cast %66 : vector<16x128xf32> to vector<1x16x128xf32>
    tpu.vector_store %arg7[%c0_40, %c0_41, %c256], %85 {strides = array<i32>} : memref<1x16x640xf32, #tpu.memory_space<vmem>>, vector<1x16x128xf32>,
    %86 = arith.mulf %1, %64 : vector<16x128xf32>
    %c0_42 = arith.constant 0 : index
    %c0_43 = arith.constant 0 : index
    %c384 = arith.constant 384 : index
    %87 = vector.load %arg7[%c0_42, %c0_43, %c384] : memref<1x16x640xf32, #tpu.memory_space<vmem>>, vector<1x16x128xf32>
    %88 = vector.shape_cast %87 : vector<1x16x128xf32> to vector<16x128xf32>
    %89 = vector.shape_cast %86 : vector<16x128xf32> to vector<1x16x128xf32>
    tpu.vector_store %arg7[%c0_42, %c0_43, %c384], %89 {strides = array<i32>} : memref<1x16x640xf32, #tpu.memory_space<vmem>>, vector<1x16x128xf32>,
    %90 = arith.mulf %1, %66 : vector<16x128xf32>
    %c0_44 = arith.constant 0 : index
    %c0_45 = arith.constant 0 : index
    %c512 = arith.constant 512 : index
    %91 = vector.load %arg7[%c0_44, %c0_45, %c512] : memref<1x16x640xf32, #tpu.memory_space<vmem>>, vector<1x16x128xf32>
    %92 = vector.shape_cast %91 : vector<1x16x128xf32> to vector<16x128xf32>
    %93 = vector.shape_cast %90 : vector<16x128xf32> to vector<1x16x128xf32>
    tpu.vector_store %arg7[%c0_44, %c0_45, %c512], %93 {strides = array<i32>} : memref<1x16x640xf32, #tpu.memory_space<vmem>>, vector<1x16x128xf32>,
    %94 = vector.broadcast %74 : vector<32x1xf32> to vector<32x128xf32>
    %95 = arith.mulf %3, %94 : vector<32x128xf32>
    %c0_46 = arith.constant 0 : index
    %c0_47 = arith.constant 0 : index
    %c0_48 = arith.constant 0 : index
    %96 = vector.load %arg8[%c0_46, %c0_47, %c0_48] : memref<1x32x640xf32, #tpu.memory_space<vmem>>, vector<1x32x128xf32>
    %97 = vector.shape_cast %96 : vector<1x32x128xf32> to vector<32x128xf32>
    %98 = vector.shape_cast %95 : vector<32x128xf32> to vector<1x32x128xf32>
    tpu.vector_store %arg8[%c0_46, %c0_47, %c0_48], %98 {strides = array<i32>} : memref<1x32x640xf32, #tpu.memory_space<vmem>>, vector<1x32x128xf32>,
    %c0_49 = arith.constant 0 : index
    %c0_50 = arith.constant 0 : index
    %c128_51 = arith.constant 128 : index
    %99 = vector.load %arg8[%c0_49, %c0_50, %c128_51] : memref<1x32x640xf32, #tpu.memory_space<vmem>>, vector<1x32x128xf32>
    %100 = vector.shape_cast %99 : vector<1x32x128xf32> to vector<32x128xf32>
    %101 = vector.shape_cast %63 : vector<32x128xf32> to vector<1x32x128xf32>
    tpu.vector_store %arg8[%c0_49, %c0_50, %c128_51], %101 {strides = array<i32>} : memref<1x32x640xf32, #tpu.memory_space<vmem>>, vector<1x32x128xf32>,
    %c0_52 = arith.constant 0 : index
    %c0_53 = arith.constant 0 : index
    %c256_54 = arith.constant 256 : index
    %102 = vector.load %arg8[%c0_52, %c0_53, %c256_54] : memref<1x32x640xf32, #tpu.memory_space<vmem>>, vector<1x32x128xf32>
    %103 = vector.shape_cast %102 : vector<1x32x128xf32> to vector<32x128xf32>
    %104 = vector.shape_cast %65 : vector<32x128xf32> to vector<1x32x128xf32>
    tpu.vector_store %arg8[%c0_52, %c0_53, %c256_54], %104 {strides = array<i32>} : memref<1x32x640xf32, #tpu.memory_space<vmem>>, vector<1x32x128xf32>,
    %105 = arith.mulf %3, %63 : vector<32x128xf32>
    %c0_55 = arith.constant 0 : index
    %c0_56 = arith.constant 0 : index
    %c384_57 = arith.constant 384 : index
    %106 = vector.load %arg8[%c0_55, %c0_56, %c384_57] : memref<1x32x640xf32, #tpu.memory_space<vmem>>, vector<1x32x128xf32>
    %107 = vector.shape_cast %106 : vector<1x32x128xf32> to vector<32x128xf32>
    %108 = vector.shape_cast %105 : vector<32x128xf32> to vector<1x32x128xf32>
    tpu.vector_store %arg8[%c0_55, %c0_56, %c384_57], %108 {strides = array<i32>} : memref<1x32x640xf32, #tpu.memory_space<vmem>>, vector<1x32x128xf32>,
    %109 = arith.mulf %3, %65 : vector<32x128xf32>
    %c0_58 = arith.constant 0 : index
    %c0_59 = arith.constant 0 : index
    %c512_60 = arith.constant 512 : index
    %110 = vector.load %arg8[%c0_58, %c0_59, %c512_60] : memref<1x32x640xf32, #tpu.memory_space<vmem>>, vector<1x32x128xf32>
    %111 = vector.shape_cast %110 : vector<1x32x128xf32> to vector<32x128xf32>
    %112 = vector.shape_cast %109 : vector<32x128xf32> to vector<1x32x128xf32>
    tpu.vector_store %arg8[%c0_58, %c0_59, %c512_60], %112 {strides = array<i32>} : memref<1x32x640xf32, #tpu.memory_space<vmem>>, vector<1x32x128xf32>,
    return
  }
  func.func @transform_0(%arg0: i32) -> (i32, i32) {
    %c0_i32 = arith.constant 0 : i32
    %c0_i32_0 = arith.constant 0 : i32
    %c0_i32_1 = arith.constant 0 : i32
    return %c0_i32, %c0_i32_0 : i32, i32
  }
  func.func @transform_1(%arg0: i32) -> (i32, i32, i32) {
    %c0_i32 = arith.constant 0 : i32
    %c0_i32_0 = arith.constant 0 : i32
    %c0_i32_1 = arith.constant 0 : i32
    return %arg0, %c0_i32, %c0_i32_0 : i32, i32, i32
  }
  func.func @transform_2(%arg0: i32) -> (i32, i32, i32) {
    %c0_i32 = arith.constant 0 : i32
    %c0_i32_0 = arith.constant 0 : i32
    %c0_i32_1 = arith.constant 0 : i32
    return %arg0, %c0_i32, %c0_i32_0 : i32, i32, i32
  }
  func.func @transform_3(%arg0: i32) -> (i32, i32, i32) {
    %c0_i32 = arith.constant 0 : i32
    %c0_i32_0 = arith.constant 0 : i32
    %c0_i32_1 = arith.constant 0 : i32
    return %arg0, %c0_i32, %c0_i32_0 : i32, i32, i32
  }
  func.func @transform_4(%arg0: i32) -> (i32, i32, i32) {
    %c0_i32 = arith.constant 0 : i32
    %c0_i32_0 = arith.constant 0 : i32
    %c0_i32_1 = arith.constant 0 : i32
    return %arg0, %c0_i32, %c0_i32_0 : i32, i32, i32
  }
  func.func @transform_5(%arg0: i32) -> (i32, i32, i32) {
    %c0_i32 = arith.constant 0 : i32
    %c0_i32_0 = arith.constant 0 : i32
    %c0_i32_1 = arith.constant 0 : i32
    return %arg0, %c0_i32, %c0_i32_0 : i32, i32, i32
  }
  func.func @transform_6(%arg0: i32) -> (i32, i32, i32) {
    %c0_i32 = arith.constant 0 : i32
    %c0_i32_0 = arith.constant 0 : i32
    %c0_i32_1 = arith.constant 0 : i32
    return %arg0, %c0_i32, %c0_i32_0 : i32, i32, i32
  }
  func.func @transform_7(%arg0: i32) -> (i32, i32, i32) {
    %c0_i32 = arith.constant 0 : i32
    %c0_i32_0 = arith.constant 0 : i32
    %c0_i32_1 = arith.constant 0 : i32
    return %arg0, %c0_i32, %c0_i32_0 : i32, i32, i32
  }
}

</mosaic_0001>

<bundles_post_ra>
// kernel: interaction_pallas.1
= control target key start
LH: loop header
LB: loop body
LE: loop exit
PB: predicated region body
PF: predicated region fallthrough
CT: control target
= control target key end

     0   :  { %13 = vsyncpa [#allocation3], 0  ;;  %s2086_s0 = inlined_call_operand.vmem [shape: f32[3,128], index: 0, kind: input, shape index: {}]   ;;  %s2087_s1 = inlined_call_operand.vmem [shape: f32[2,16,128], index: 1, kind: input, shape index: {}]   ;;  %s2088_s2 = inlined_call_operand.vmem [shape: f32[2,32,128], index: 2, kind: input, shape index: {}]   ;;  %s2089_s3 = inlined_call_operand.vmem [shape: f32[2,1,16], index: 3, kind: input, shape index: {}]   ;;  %s2090_s4 = inlined_call_operand.vmem [shape: f32[2,16,1], index: 4, kind: input, shape index: {}]   ;;  %s2091_s5 = inlined_call_operand.vmem [shape: f32[2,32,1], index: 5, kind: input, shape index: {}]   ;;  %s2092_s6 = inlined_call_operand.hbm [shape: f32[2,16,640], index: 6, kind: output, shape index: {0}]   ;;  %s2093_s7 = inlined_call_operand.hbm [shape: f32[2,32,640], index: 7, kind: output, shape index: {1}]  }
   0x1   :  { %15 = vsyncpa [#allocation3 + $0x1], 0 }
   0x2   :  { %16 = vsyncpa [#allocation5], 0 }
   0x3   :  { %18 = vsyncpa [#allocation5 + $0x1], 0  ;;  %s1693_s24 = smov 0   ;;  %s1695_s25 = smov 0  }
   0x4   :  { %s1697_s26 = smov 0   ;;  %s1699_s27 = smov 0  }
   0x5 LB: > { %s1714_s28 = sadd.s32 4294967295, %s1645_s27   ;;  %s1300_s29 = sadd.s32 4294967294, %s1645_s27   ;;  %s1645_s27 = sphi %s1699_s27, %s2109_s27   ;;  %s1641_s26 = sphi %s1697_s26, %s2108_s26   ;;  %s1637_s25 = sphi %s1695_s25, %s2107_s25   ;;  %s1633_s24 = sphi %s1693_s24, %s2106_s24  }
   0x6   : > { %s1718_s30 = sadd.s32 1, %s1645_s27   ;;  %s182_s8 = sadd.s32 1, %s1641_s26 }
   0x7   : > { %s179_s9 = ssub.s32 %s1645_s27, %s1718_s30  ;;  %p192_p0 = scmp.ne.s32.totalorder %s1641_s26, %s1637_s25 }
   0x8   : > { %p180_p1 = scmp.eq.s32.totalorder %s179_s9, 0  ;;  %p193_p2 = scmp.eq.s32.totalorder %s1714_s28, 1 }
   0x9   : > { %p198_p3 = scmp.ne.s32.totalorder %s1637_s25, %s1633_s24  ;;  %p199_p4 = scmp.eq.s32.totalorder %s1300_s29, 1 }
   0xa   : > { %s1729_s10 = scalar_select %p180_p1, %s1641_s26, %s182_s8  }
   0xb   : > { %p1731_p5 = por %p193_p2, %p192_p0  ;;  %p1735_p6 = por %p199_p4, %p198_p3 }
   0xc   : > { %2094 = sst [smem:[#allocation8_spill]] %s1729_s10  ;;  %p1303_p7 = scmp.ge.s32.totalorder %s1645_s27, 1 }
   0xd   : > { %p284_p8 = scmp.lt.s32.totalorder %s1645_s27, 3 }
   0xf   : > { %p285_p9 = pnand %p1303_p7, %p284_p8 }
  0x10   : > { %p339_p10 = scmp.lt.s32.totalorder (!%p285_p9), %s1714_s28, 1  ;;  %v1647_v0 = vmov (!%p285_p9), 0   ;;  %v1317_v1 = vld [vmem:[%s2086_s0 + $0x2] ss:$0 sm:$0xff] (!%p285_p9)  ;;  %v1318_v2 = vld [vmem:[%s2086_s0] ss:$0 sm:$0xff] (!%p285_p9) }
  0x11   : > { %288 = sbr.rel (%p285_p9) target bundleno = 1052 (0x41c), region = 44  ;;  %1509 = vset.pattern.permute.xlu1 (!%p285_p9), %v1647_v0  ;;  %1508 = vset.pattern.permute.xlu0 (!%p285_p9), %v1647_v0  ;;  %v1319_v3 = vld [vmem:[%s2086_s0 + $0x1] ss:$0 sm:$0xff] (!%p285_p9)  ;;  %vm565_vm8 = vcmask (!%p285_p9), 130048  }
  0x12   : > { %s1458_s9 = smul.u32 (!%p285_p9), 1280, %s1714_s28 }
  0x18   : > { %s1743_s13 = scalar_select %p339_p10, %s1714_s28, 1 }
  0x1a   : > { %s1342_s14 = sshll.u32 %s1743_s13, 4  ;;  %s1343_s15 = sshll.u32 %s1743_s13, 5 }
  0x1b   : > { %s343_s20 = scalar_lea.vmem %s2087_s1, %s1342_s14  ;;  %s348_s23 = scalar_lea.vmem %s2088_s2, %s1343_s15 }
  0x1c   : > { %v1766_v4 = vld [vmem:[%s343_s20] sm:$0xff]  ;;  %v1768_v5 = vld [vmem:[%s343_s20 + $0x8] sm:$0xff]  ;;  %v1777_v10 = vld [vmem:[%s348_s23 + $0x10] sm:$0xff]  ;;  %s361_s17 = scalar_lea.vmem %s2091_s5, %s1343_s15  ;;  %s351_s19 = scalar_lea.vmem %s2089_s3, %s1743_s13 }
  0x1d   : > { %v1770_v6 = vld [vmem:[%s348_s23] sm:$0xff]  ;;  %v1428_v7 = vpack.c.bf16 %v1768_v5, %v1766_v4  ;;  %v1775_v9 = vld [vmem:[%s348_s23 + $0x8] sm:$0xff]  ;;  %v466_v12 = vmul.f32 %v1319_v3, %v1777_v10  ;;  %v1782_v15 = vld [vmem:[%s348_s23 + $0x18] sm:$0xff]  ;;  %v450_v17 = vmul.f32 %v1317_v1, %v1777_v10  ;;  %s356_s22 = scalar_lea.vmem %s2090_s4, %s1342_s14  ;;  %s1920_s13 = sand.u32 1, %s1637_s25  }
  0x1e   : > { %v448_v8 = vmul.f32 %v1317_v1, %v1770_v6  ;;  %v464_v11 = vmul.f32 %v1319_v3, %v1770_v6  ;;  %v449_v14 = vmul.f32 %v1317_v1, %v1775_v9  ;;  %v465_v16 = vmul.f32 %v1319_v3, %v1775_v9  ;;  %v1793_v23 = vld [vmem:[%s361_s17] sm:$0xff]  ;;  %v1798_v25 = vld [vmem:[%s361_s17 + $0x8] sm:$0xff]  ;;  %v1805_v27 = vld [vmem:[%s361_s17 + $0x10] sm:$0xff]  ;;  %s1456_s14 = smul.u32 80, %s1920_s13  ;;  %s1990_s15 = scalar_lea.hbm %s2092_s6, %s1458_s9 }
  0x1f   : > { %1429 = vmatprep.subr.bf16.mxu0 %v1428_v7  ;;  %472 = vadd.xlane.f32.xlu1 %v466_v12  ;;  %v467_v18 = vmul.f32 %v1319_v3, %v1782_v15  ;;  %v451_v20 = vmul.f32 %v1317_v1, %v1782_v15  ;;  %v458_v21 = vadd.f32 %v1318_v2, %v450_v17  ;;  %vm408_vm0 = vcmp.gt.f32.partialorder %v1793_v23, 0.0  ;;  %v1811_v29 = vld [vmem:[%s361_s17 + $0x18] sm:$0xff]  ;;  %v1312_v41 = vld [vmem:[%s351_s19] ss:$0 sm:$0xff]  ;;  %s1457_s23 = smul.u32 160, %s1920_s13  ;;  %s1127_s18 = scalar_lea.sflag [#allocation3], %s1920_s13 }
  0x20   : > { %v456_v13 = vadd.f32 %v1318_v2, %v448_v8  ;;  %468 = vadd.xlane.f32.xlu0 %v464_v11  ;;  %1431 = vmatpush3.bf16.xpose.msra.mxu0 %v1428_v7  ;;  %v457_v19 = vadd.f32 %v1318_v2, %v449_v14  ;;  %v412_v24 = vsel %vm408_vm0, 1, %v1647_v0  ;;  %vm409_vm1 = vcmp.gt.f32.partialorder %v1798_v25, 0.0  ;;  %s1926_s29 = scalar_lea.vmem [#allocation2], %s1456_s14  ;;  %s1649_s20 = smov [#allocation2]  }
  0x21   : > { %1433 = vmatprep.subr.bf16.mxu1 %v1428_v7  ;;  %v459_v22 = vadd.f32 %v1318_v2, %v451_v20  ;;  %v413_v26 = vsel %vm409_vm1, 1, %v1647_v0  ;;  %vm410_vm2 = vcmp.gt.f32.partialorder %v1805_v27, 0.0  ;;  %vm411_vm3 = vcmp.gt.f32.partialorder %v1811_v29, 0.0  ;;  %s1941_s8 = scalar_lea.vmem [#allocation4], %s1457_s23  ;;  %s1145_s10 = sshll.u32 %s1926_s29, 4  ;;  %s1983_s10 = int_to_ptr.vmem [resolvable:$true] %s1145_s10 }
  0x22   : > { %1380 = vmatprep.mubr.f32.mxu0 %v456_v13  ;;  %1435 = vmatpush3.bf16.msra.mxu1 %v1428_v7  ;;  %v414_v28 = vsel %vm410_vm2, 1, %v1647_v0  ;;  %v415_v30 = vsel %vm411_vm3, 1, %v1647_v0  ;;  %s1551_s19 = scalar_lea.vmem %s1983_s10, 1280  ;;  %s1555_s21 = sshll.u32 %s1649_s20, 4  ;;  %s1556_s21 = int_to_ptr.vmem [resolvable:$false] %s1555_s21 }
  0x23   : > { %474 = vadd.xlane.f32.xlu1 %v467_v18  ;;  %p1552_p11 = scmp.ne.s32.totalorder %s1983_s10, %s1551_s19  ;;  %p1558_p0 = scmp.lt.s32.totalorder %s1983_s10, %s1556_s21 }
  0x24   : > { %470 = vadd.xlane.f32.xlu0 %v465_v16 }
  0x25   : > { %p1553_p12 = pnand %p1552_p11, %p1731_p5 }
  0x27   : > { %1381 = vmatmul.mubr.f32.vlgmr.msra.gmra.mrb[0].mxu0 %v457_v19  ;;  %p1554_p13 = pneg %p1553_p12 }
  0x28   : > { %1383 = vmatprep.mubr.f32.mxu0 %v458_v21 }
  0x2b   : > { %1384 = vmatmul.mubr.f32.gmra.mrb[2].mxu0 %v459_v22 }
  0x34   : > { %417 = vperm.xlu1 %1509, %v412_v24  }
  0x38   : > { %385 = vperm.xlu1 %1509, %v1798_v25  }
  0x3a   : > { %380 = vperm.xlu0 %1508, %v1793_v23  }
  0x3c   : > { %420 = vperm.xlu1 %1509, %v413_v26   ;;  %v1648_v26 = vmov 0.0  }
  0x3d   : > { %v1334_v49 = vsel %vm408_vm0, 1.0, %v1648_v26  ;;  %v1337_v57 = vsel %vm411_vm3, 1.0, %v1648_v26 }
  0x40   : > { %390 = vperm.xlu1 %1509, %v1805_v27  }
  0x44   : > { %423 = vperm.xlu1 %1509, %v414_v28  }
  0x48   : > { %395 = vperm.xlu1 %1509, %v1811_v29  }
  0x4c   : > { %426 = vperm.xlu1 %1509, %v415_v30  }
  0xac   : > { %v473_v31 = vpop.xlane.xlu1 %472 }
  0xad   : > { %v469_v37 = vpop.xlane.xlu0 %468 }
  0xb0   : > { %v475_v32 = vpop.xlane.xlu1 %474 }
  0xb1   : > { %v471_v39 = vpop.xlane.xlu0 %470 }
  0xb4   : > { %v418_v33 = vpop.permute.xlu1 %417 }
  0xb5   : > { %vm428_vm6 = vcmp.eq.s32.totalorder %v418_v33, 1 }
  0xb8   : > { %v386_v34 = vpop.permute.xlu1 %385 }
  0xb9   : > { %v381_v42 = vpop.permute.xlu0 %380  ;;  %vm405_vm4 = vcmp.eq.f32.partialorder %v386_v34, %v1312_v41 }
  0xba   : > { %vm404_vm7 = vcmp.eq.f32.partialorder %v381_v42, %v1312_v41 }
  0xbb   : > { %vm1825_vm12 = vmand %vm404_vm7, %vm428_vm6 }
  0xbc   : > { %v421_v35 = vpop.permute.xlu1 %420 }
  0xbd   : > { %vm429_vm5 = vcmp.eq.s32.totalorder %v421_v35, 1 }
  0xbe   : > { %vm1821_vm9 = vmand %vm405_vm4, %vm429_vm5 }
  0xbf   : > { %v1314_v28 = vsel %vm1821_vm9, 1.0, %v1648_v26 }
  0xc0   : > { %v391_v36 = vpop.permute.xlu1 %390 }
  0xc1   : > { %vm406_vm13 = vcmp.eq.f32.partialorder %v391_v36, %v1312_v41 }
  0xc4   : > { %v424_v38 = vpop.permute.xlu1 %423 }
  0xc5   : > { %vm430_vm14 = vcmp.eq.s32.totalorder %v424_v38, 1 }
  0xc6   : > { %vm1845_vm4 = vmand %vm406_vm13, %vm430_vm14 }
  0xc8   : > { %v396_v40 = vpop.permute.xlu1 %395 }
  0xc9   : > { %vm407_vm10 = vcmp.eq.f32.partialorder %v396_v40, %v1312_v41 }
  0xcc   : > { %v427_v43 = vpop.permute.xlu1 %426 }
  0xcd   : > { %vm431_vm11 = vcmp.eq.s32.totalorder %v427_v43, 1 }
  0xce   : > { %vm1841_vm15 = vmand %vm407_vm10, %vm431_vm11 }
  0xcf   : > { %v1316_v34 = vsel %vm1841_vm15, 1.0, %v1648_v26 }
  0xfa   : > { %v1382_v44 = vpop.f32.mrb[0].mxu0 }
  0xfb   : > { %v548_v45 = vadd.f32 %v1382_v44, %v471_v39  ;;  %v542_v46 = vpop.f32.mrb[1].mxu0 }
  0xfc   : > { %v543_v48 = vadd.f32 %v542_v46, %v469_v37  ;;  %v1313_v37 = vsel %vm1825_vm12, 1.0, %v1648_v26 }
  0xfd   : > { %v1831_v50 = vsel %vm1821_vm9, %v548_v45, -1e+30  ;;  %vm796_vm9 = vcmask 261120  }
  0xfe   : > { %v1835_v51 = vsel %vm1825_vm12, %v543_v48, -1e+30  ;;  %v1385_v52 = vpop.f32.mrb[2].mxu0  ;;  %v569_v53 = vsel %vm565_vm8, %v1831_v50, -inf }
  0xff   : > { %v558_v54 = vadd.f32 %v1385_v52, %v475_v32  ;;  %570 = vmax.xlane.f32.xlu0 %v569_v53  ;;  %v552_v55 = vpop.f32.mrb[3].mxu0  ;;  %v566_v56 = vsel %vm565_vm8, %v1835_v51, -inf  ;;  %v1335_v52 = vsel %vm409_vm1, 1.0, %v1648_v26 }
 0x100   : > { %v553_v58 = vadd.f32 %v552_v55, %v473_v31  ;;  %567 = vmax.xlane.f32.xlu1 %v566_v56  ;;  %v622_v59 = vmax.f32 %v566_v56, %v569_v53  ;;  %v1315_v31 = vsel %vm1845_vm4, 1.0, %v1648_v26  ;;  %v1515_v55 = vpack.i.bf16 %v1335_v52, %v1334_v49 }
 0x101   : > { %v1851_v61 = vsel %vm1841_vm15, %v558_v54, -1e+30  ;;  %v1336_v56 = vsel %vm410_vm2, 1.0, %v1648_v26 }
 0x102   : > { %v1855_v62 = vsel %vm1845_vm4, %v553_v58, -1e+30  ;;  %v575_v63 = vsel %vm565_vm8, %v1851_v61, -inf  ;;  %v1520_v60 = vpack.i.bf16 %v1337_v57, %v1336_v56 }
 0x103   : > { %v572_v0 = vsel %vm565_vm8, %v1855_v62, -inf }
 0x104   : > { %573 = vmax.xlane.f32.xlu0 %v572_v0  ;;  %v623_v1 = vmax.f32 %v572_v0, %v575_v63  ;;  %576 = vmax.xlane.f32.xlu1 %v575_v63 }
 0x106   : > { %v624_v2 = vmax.f32 %v622_v59, %v623_v1 }
 0x108   : > { %v625_v3 = vrot.slane %v624_v2, 4 }
 0x10a   : > { %v626_v7 = vmax.f32 %v624_v2, %v625_v3 }
 0x10c   : > { %v627_v8 = vrot.slane %v626_v7, 2 }
 0x10e   : > { %v628_v11 = vmax.f32 %v626_v7, %v627_v8 }
 0x110   : > { %v629_v12 = vrot.slane %v628_v11, 1 }
 0x112   : > { %v630_v13 = vmax.f32 %v628_v11, %v629_v12 }
 0x114   : > { %v631_v14 = vsub.f32 %v1835_v51, %v630_v13  ;;  %v632_v16 = vsub.f32 %v1831_v50, %v630_v13  ;;  %v633_v17 = vsub.f32 %v1855_v62, %v630_v13  ;;  %v634_v18 = vsub.f32 %v1851_v61, %v630_v13 }
 0x116   : > { %v637_v19 = vmul.f32 1.442695, %v632_v16  ;;  %v639_v20 = vmul.f32 1.442695, %v633_v17  ;;  %v641_v21 = vmul.f32 1.442695, %v634_v18 }
 0x117   : > { %v635_v22 = vmul.f32 1.442695, %v631_v14 }
 0x118   : > { %1525 = vpow2.f32 %v637_v19 }
 0x119   : > { %1527 = vpow2.f32 %v639_v20 }
 0x11a   : > { %1529 = vpow2.f32 %v641_v21 }
 0x11b   : > { %1531 = vpow2.f32 %v635_v22 }
 0x122   : > { %v1526_v24 = vpop.eup %1525 }
 0x123   : > { %v1528_v30 = vpop.eup %1527  ;;  %v644_v32 = vmul.f32 %v1526_v24, %v1314_v28 }
 0x124   : > { %v1530_v33 = vpop.eup %1529  ;;  %v645_v35 = vmul.f32 %v1528_v30, %v1315_v31 }
 0x125   : > { %v1532_v36 = vpop.eup %1531  ;;  %v646_v38 = vmul.f32 %v1530_v33, %v1316_v34  ;;  %v648_v40 = vsel %vm565_vm8, %v644_v32, 0.0  ;;  %v369_v33 = vld [vmem:[%s356_s22] sm:$0xff] }
 0x126   : > { %v643_v39 = vmul.f32 %v1532_v36, %v1313_v37  ;;  %v650_v43 = vsel %vm565_vm8, %v645_v35, 0.0  ;;  %vm1038_vm0 = vcmp.gt.f32.partialorder %v369_v33, 0.0 }
 0x127   : > { %v652_v45 = vsel %vm565_vm8, %v646_v38, 0.0 }
 0x128   : > { %v647_v41 = vsel %vm565_vm8, %v643_v39, 0.0 }
 0x129   : > { %v649_v42 = vadd.f32 %v648_v40, %v647_v41 }
 0x12b   : > { %v651_v44 = vadd.f32 %v650_v43, %v649_v42 }
 0x12d   : > { %v653_v46 = vadd.f32 %v652_v45, %v651_v44 }
 0x12f   : > { %v654_v47 = vrot.slane %v653_v46, 4 }
 0x131   : > { %v655_v48 = vadd.f32 %v654_v47, %v653_v46 }
 0x133   : > { %v656_v53 = vrot.slane %v655_v48, 2 }
 0x135   : > { %v657_v54 = vadd.f32 %v656_v53, %v655_v48 }
 0x137   : > { %v658_v58 = vrot.slane %v657_v54, 1 }
 0x139   : > { %v659_v59 = vadd.f32 %v658_v58, %v657_v54 }
 0x13b   : > { %vm660_vm5 = vcmp.eq.f32.partialorder %v659_v59, 0.0 }
 0x13c   : > { %v661_v23 = vsel %vm660_vm5, 1.0, %v659_v59  ;;  %v1440_v59 = vpack.c.bf16 %v1782_v15, %v1777_v10 }
 0x13d   : > { %1533 = vrcp.f32 %v661_v23 }
 0x147   : > { %v1534_v63 = vpop.eup %1533 }
 0x148   : > { %v663_v25 = vmul.f32 %v1534_v63, %v643_v39  ;;  %v664_v0 = vmul.f32 %v1534_v63, %v644_v32  ;;  %v665_v1 = vmul.f32 %v1534_v63, %v645_v35  ;;  %v666_v2 = vmul.f32 %v1534_v63, %v646_v38  ;;  %v370_v35 = vld [vmem:[%s356_s22 + $0x8] sm:$0xff]  ;;  %s1557_s22 = scalar_lea.vmem %s1556_s21, 2560 }
 0x149   : > { %vm1039_vm1 = vcmp.gt.f32.partialorder %v370_v35, 0.0  ;;  %p1559_p1 = scmp.lt.s32.totalorder %s1557_s22, %s1551_s19 }
 0x14b   : > { %p1560_p2 = por %p1559_p1, %p1558_p0 }
 0x14d   : > { %p1561_p3 = pnand %p1560_p2, %p1554_p13 }
 0x18c   : > { %v571_v3 = vpop.xlane.xlu0 %570 }
 0x18d   : > { %v579_v7 = vsub.f32 %v1831_v50, %v571_v3  ;;  %v568_v27 = vpop.xlane.xlu1 %567 }
 0x18e   : > { %v578_v8 = vsub.f32 %v1835_v51, %v568_v27 }
 0x18f   : > { %v584_v11 = vmul.f32 1.442695, %v579_v7 }
 0x190   : > { %v582_v29 = vmul.f32 1.442695, %v578_v8 }
 0x191   : > { %1535 = vpow2.f32 %v584_v11  ;;  %v574_v12 = vpop.xlane.xlu0 %573  ;;  %v577_v13 = vpop.xlane.xlu1 %576 }
 0x192   : > { %1537 = vpow2.f32 %v582_v29  ;;  %v580_v14 = vsub.f32 %v1855_v62, %v574_v12  ;;  %v581_v16 = vsub.f32 %v1851_v61, %v577_v13 }
 0x194   : > { %v586_v17 = vmul.f32 1.442695, %v580_v14  ;;  %v588_v18 = vmul.f32 1.442695, %v581_v16 }
 0x196   : > { %1539 = vpow2.f32 %v586_v17 }
 0x197   : > { %1541 = vpow2.f32 %v588_v18 }
 0x19b   : > { %v1536_v19 = vpop.eup %1535 }
 0x19c   : > { %v1538_v50 = vpop.eup %1537  ;;  %v1897_v20 = vmul.f32 %v1536_v19, %v1314_v28 }
 0x19d   : > { %v590_v51 = vmul.f32 %v1538_v50, %v1313_v37  ;;  %v1436_v37 = vpack.c.bf16 %v1775_v9, %v1770_v6 }
 0x19e   : > { %v597_v21 = vsel %vm565_vm8, %v1897_v20, 0.0 }
 0x19f   : > { %598 = vadd.xlane.f32.xlu1 %v597_v21  ;;  %v594_v22 = vsel %vm565_vm8, %v590_v51, 0.0  ;;  %1437 = vmatprep.subr.bf16.mxu1 %v1436_v37 }
 0x1a0   : > { %v1540_v24 = vpop.eup %1539  ;;  %595 = vadd.xlane.f32.xlu0 %v594_v22 }
 0x1a1   : > { %v1542_v62 = vpop.eup %1541  ;;  %v1902_v61 = vmul.f32 %v1540_v24, %v1315_v31  ;;  %v1332_v31 = vsel %vm1038_vm0, 1.0, %v1648_v26 }
 0x1a2   : > { %v1904_v30 = vmul.f32 %v1542_v62, %v1316_v34  ;;  %v1333_v34 = vsel %vm1039_vm1, 1.0, %v1648_v26 }
 0x1a3   : > { %v600_v32 = vsel %vm565_vm8, %v1902_v61, 0.0  ;;  %v1510_v36 = vpack.i.bf16 %v1333_v34, %v1332_v31 }
 0x1a4   : > { %601 = vadd.xlane.f32.xlu0 %v600_v32  ;;  %v603_v28 = vsel %vm565_vm8, %v1904_v30, 0.0 }
 0x1a5   : > { %604 = vadd.xlane.f32.xlu1 %v603_v28 }
 0x1b6   : > { %1511 = vperm.xlu1 %1509, %v1510_v36  }
 0x1ba   : > { %1516 = vperm.xlu1 %1509, %v1515_v55  }
 0x1be   : > { %1521 = vperm.xlu1 %1509, %v1520_v60  }
 0x1d1   : > { %764 = vxpose.xlu0.b32.start [1/4] (short) (narrow) %v663_v25, 16 }
 0x1d5   : > { %765 = vxpose.xlu0.b32.cont [2/4] (short) (narrow) %v664_v0, 16 }
 0x1d9   : > { %766 = vxpose.xlu0.b32.cont [3/4] (short) (narrow) %v665_v1, 16 }
 0x1dd   : > { %767 = vxpose.xlu0.b32.end [4/4] (short) (narrow) %v666_v2, 16 }
 0x22c   : > { %v599_v38 = vpop.xlane.xlu1 %598 }
 0x22d   : > { %vm607_vm2 = vcmp.eq.f32.partialorder %v599_v38, 0.0  ;;  %v596_v39 = vpop.xlane.xlu0 %595 }
 0x22e   : > { %v611_v40 = vsel %vm607_vm2, 1.0, %v599_v38  ;;  %vm606_vm3 = vcmp.eq.f32.partialorder %v596_v39, 0.0 }
 0x22f   : > { %1543 = vrcp.f32 %v611_v40  ;;  %v610_v26 = vsel %vm606_vm3, 1.0, %v596_v39 }
 0x230   : > { %1545 = vrcp.f32 %v610_v26 }
 0x231   : > { %v602_v41 = vpop.xlane.xlu0 %601 }
 0x232   : > { %vm608_vm6 = vcmp.eq.f32.partialorder %v602_v41, 0.0  ;;  %v605_v42 = vpop.xlane.xlu1 %604 }
 0x233   : > { %v612_v43 = vsel %vm608_vm6, 1.0, %v602_v41  ;;  %vm609_vm7 = vcmp.eq.f32.partialorder %v605_v42, 0.0 }
 0x234   : > { %1547 = vrcp.f32 %v612_v43  ;;  %v613_v44 = vsel %vm609_vm7, 1.0, %v605_v42 }
 0x235   : > { %1549 = vrcp.f32 %v613_v44 }
 0x236   : > { %v1512_v45 = vpop.permute.xlu1 %1511 }
 0x237   : > { %v1514_v46 = vunpack.i.h.bf16 %v1512_v45  ;;  %v1513_v47 = vunpack.i.l.bf16 %v1512_v45 }
 0x239   : > { %v1544_v48 = vpop.eup %1543  ;;  %v1059_v49 = vmul.f32 %v1514_v46, %v1768_v5  ;;  %v1058_v52 = vmul.f32 %v1513_v47, %v1766_v4 }
 0x23a   : > { %v1546_v53 = vpop.eup %1545  ;;  %v1517_v54 = vpop.permute.xlu1 %1516  ;;  %v1931_v58 = vmul.f32 %v1544_v48, %v1897_v20 }
 0x23b   : > { %1060 = vst [vmem:[%s1926_s29] sm:$0xff] %v1058_v52  ;;  %1061 = vst [vmem:[%s1926_s29 + $0x28] sm:$0xff] %v1059_v49  ;;  %v1519_v55 = vunpack.i.h.bf16 %v1517_v54  ;;  %v1518_v56 = vunpack.i.l.bf16 %v1517_v54  ;;  %v615_v57 = vmul.f32 %v1546_v53, %v590_v51 }
 0x23d   : > { %v1095_v60 = vmul.f32 %v1519_v55, %v1775_v9  ;;  %v1094_v23 = vmul.f32 %v1518_v56, %v1770_v6  ;;  %1390 = vmatprep.mubr.msk.f32.mxu1 %vm565_vm8, %v615_v57  ;;  %1411 = vmatprep.mubr.msk.f32.mxu0 %vm565_vm8, %v615_v57 }
 0x23e   : > { %v1548_v63 = vpop.eup %1547  ;;  %v1522_v25 = vpop.permute.xlu1 %1521  ;;  %1391 = vmatmul.mubr.msk.f32.vlgmr.msra.gmra.mrb[0].mxu1 %vm565_vm8, %v1931_v58 }
 0x23f   : > { %v1550_v0 = vpop.eup %1549  ;;  %1098 = vst [vmem:[%s1941_s8] sm:$0xff] %v1094_v23  ;;  %1099 = vst [vmem:[%s1941_s8 + $0x28] sm:$0xff] %v1095_v60  ;;  %v1524_v1 = vunpack.i.h.bf16 %v1522_v25  ;;  %v1523_v2 = vunpack.i.l.bf16 %v1522_v25  ;;  %v619_v3 = vmul.f32 %v1548_v63, %v1902_v61  ;;  %1439 = vmatpush3.bf16.msra.mxu1 %v1436_v37 }
 0x240   : > { %v621_v7 = vmul.f32 %v1550_v0, %v1904_v30  ;;  %1441 = vmatprep.subr.bf16.mxu1 %v1440_v59 }
 0x241   : > { %v1097_v27 = vmul.f32 %v1524_v1, %v1782_v15  ;;  %v1096_v8 = vmul.f32 %v1523_v2, %v1777_v10  ;;  %1393 = vmatprep.mubr.msk.f32.mxu1 %vm565_vm8, %v619_v3 }
 0x242   : > { %1394 = vmatmul.mubr.msk.f32.gmra.mrb[2].mxu1 %vm565_vm8, %v621_v7 }
 0x243   : > { %1100 = vst [vmem:[%s1941_s8 + $0x50] sm:$0xff] %v1096_v8  ;;  %1101 = vst [vmem:[%s1941_s8 + $0x78] sm:$0xff] %v1097_v27  ;;  %1443 = vmatpush3.bf16.msra.mxu1 %v1440_v59 }
 0x251   : > { %v780_v11 = vpop.trf.xlu0 }
 0x252   : > { %1404 = vmatprep.mubr.msk.f32.mxu1 %vm796_vm9, %v780_v11 }
 0x255   : > { %v781_v29 = vpop.trf.xlu0 }
 0x256   : > { %1405 = vmatmul.mubr.msk.f32.vlgmr.msra.gmra.mrb[4].mxu1 %vm796_vm9, %v781_v29 }
 0x257   : > { %1425 = vmatprep.mubr.msk.f32.mxu1 %vm796_vm9, %v780_v11 }
 0x311   : > { %v1392_v12 = vpop.f32.mrb[0].mxu1 }
 0x312   : > { %1103 = vst [vmem:[%s1941_s8 + $0x30] sm:$0xff] %v1392_v12  ;;  %v1111_v13 = vmul.f32 %v1392_v12, %v1775_v9  ;;  %v745_v14 = vpop.f32.mrb[1].mxu1 }
 0x313   : > { %v1448_v16 = vpack.c.bf16 %v1392_v12, %v745_v14  ;;  %1102 = vst [vmem:[%s1941_s8 + $0x8] sm:$0xff] %v745_v14  ;;  %v1110_v17 = vmul.f32 %v745_v14, %v1770_v6 }
 0x314   : > { %1115 = vst [vmem:[%s1941_s8 + $0x40] sm:$0xff] %v1111_v13 }
 0x315   : > { %1114 = vst [vmem:[%s1941_s8 + $0x18] sm:$0xff] %v1110_v17  ;;  %v1395_v18 = vpop.f32.mrb[2].mxu1  ;;  %1449 = vmatprep.subr.bf16.mxu1 %v1448_v16 }
 0x316   : > { %1105 = vst [vmem:[%s1941_s8 + $0x80] sm:$0xff] %v1395_v18  ;;  %v1113_v19 = vmul.f32 %v1395_v18, %v1782_v15  ;;  %v755_v50 = vpop.f32.mrb[3].mxu1  ;;  %1451 = vmatpush3.bf16.msra.mxu1 %v1448_v16 }
 0x317   : > { %v1452_v20 = vpack.c.bf16 %v1395_v18, %v755_v50  ;;  %1104 = vst [vmem:[%s1941_s8 + $0x58] sm:$0xff] %v755_v50  ;;  %v1112_v51 = vmul.f32 %v755_v50, %v1777_v10 }
 0x318   : > { %1117 = vst [vmem:[%s1941_s8 + $0x90] sm:$0xff] %v1113_v19 }
 0x319   : > { %1116 = vst [vmem:[%s1941_s8 + $0x68] sm:$0xff] %v1112_v51  ;;  %1453 = vmatprep.subr.bf16.mxu1 %v1452_v20 }
 0x31a   : > { %1455 = vmatpush3.bf16.msra.mxu1 %v1452_v20 }
 0x31d   : > { %1426 = vmatmul.mubr.msk.f32.vlgmr.msra.gmra.mrb[6].mxu1 %vm796_vm9, %v781_v29 }
 0x329   : > { %v1406_v21 = vpop.f32.mrb[4].mxu1 }
 0x32a   : > { %1063 = vst [vmem:[%s1926_s29 + $0x30] sm:$0xff] %v1406_v21  ;;  %v1067_v22 = vmul.f32 %v1406_v21, %v1768_v5  ;;  %v869_v24 = vpop.f32.mrb[5].mxu1 }
 0x32b   : > { %v1444_v62 = vpack.c.bf16 %v1406_v21, %v869_v24  ;;  %1062 = vst [vmem:[%s1926_s29 + $0x8] sm:$0xff] %v869_v24  ;;  %v1066_v61 = vmul.f32 %v869_v24, %v1766_v4 }
 0x32c   : > { %1069 = vst [vmem:[%s1926_s29 + $0x40] sm:$0xff] %v1067_v22 }
 0x32d   : > { %1068 = vst [vmem:[%s1926_s29 + $0x18] sm:$0xff] %v1066_v61  ;;  %1445 = vmatprep.subr.bf16.mxu0 %v1444_v62 }
 0x32e   : > { %1447 = vmatpush3.bf16.msra.mxu0 %v1444_v62 }
 0x331   : > { %1412 = vmatmul.mubr.msk.f32.vlgmr.msra.gmra.mrb[4].mxu0 %vm565_vm8, %v1931_v58 }
 0x332   : > { %1414 = vmatprep.mubr.msk.f32.mxu0 %vm565_vm8, %v619_v3 }
 0x335   : > { %1415 = vmatmul.mubr.msk.f32.gmra.mrb[6].mxu0 %vm565_vm8, %v621_v7 }
 0x3f0   : > { %v1427_v30 = vpop.f32.mrb[6].mxu1 }
 0x3f1   : > { %1065 = vst [vmem:[%s1926_s29 + $0x38] sm:$0xff] %v1427_v30  ;;  %v1071_v32 = vmul.f32 %v1427_v30, %v1768_v5  ;;  %v1029_v28 = vpop.f32.mrb[7].mxu1 }
 0x3f2   : > { %1064 = vst [vmem:[%s1926_s29 + $0x10] sm:$0xff] %v1029_v28  ;;  %v1070_v33 = vmul.f32 %v1029_v28, %v1766_v4 }
 0x3f3   : > { %1073 = vst [vmem:[%s1926_s29 + $0x48] sm:$0xff] %v1071_v32 }
 0x3f4   : > { %1072 = vst [vmem:[%s1926_s29 + $0x20] sm:$0xff] %v1070_v33 }
 0x3f5   : > { %1564 = shalt.err (!%p1561_p3)
}
 0x3f6   : > { %s1565_s14 = scalar_lea.hbm %s1990_s15, 1280  ;;  %s1569_s9 = scalar_lea.hbm %s2092_s6, 2560 }
 0x3f7   : > { %p1566_p4 = scmp.ne.s32.totalorder %s1990_s15, %s1565_s14  ;;  %p1570_p9 = scmp.lt.u32.totalorder %s1990_s15, %s2092_s6 }
 0x3f8   : > { %p1571_p10 = scmp.lt.u32.totalorder %s1569_s9, %s1565_s14  ;;  %p1573_p12 = scmp.lt.u32.totalorder %s1565_s14, %s1990_s15 }
 0x3f9   : > { %p1567_p7 = pnand %p1566_p4, %p1731_p5 }
 0x3fa   : > { %p1572_p11 = por %p1571_p10, %p1570_p9 }
 0x3fb   : > { %p1568_p8 = pneg %p1567_p7 }
 0x3fc   : > { %p1574_p13 = por %p1573_p12, %p1572_p11 }
 0x3fe   : > { %p1575_p0 = pnand %p1574_p13, %p1568_p8 }
 0x400   : > { %1578 = shalt.err (!%p1575_p0)
}
 0x401   : > { %s1650_s19 = smov 640   ;;  %s1651_s20 = smov 40  }
 0x402   : > { %1460 = dma.vmem_to_hbm [thread:$0]  (%p1731_p5), %s1983_s10, 1280, %s1990_s15, %s1127_s18, %s1650_s19, %s1650_s19, %s1651_s20  }
 0x403   : > { %s1459_s21 = smul.u32 2560, %s1714_s28  ;;  %s1161_s22 = sshll.u32 %s1941_s8, 4  ;;  %s2038_s22 = int_to_ptr.vmem [resolvable:$true] %s1161_s22 }
 0x404   : > { %v1413_v4 = vpop.f32.mrb[4].mxu0  ;;  %s1132_s28 = scalar_lea.sflag [#allocation5], %s1920_s13  ;;  %s1579_s14 = scalar_lea.vmem %s2038_s22, 2560 }
 0x405   : > { %1107 = vst [vmem:[%s1941_s8 + $0x38] sm:$0xff] %v1413_v4  ;;  %v1119_v5 = vmul.f32 %v1413_v4, %v1775_v9  ;;  %v944_v35 = vpop.f32.mrb[5].mxu0  ;;  %s2036_s18 = scalar_lea.hbm %s2093_s7, %s1459_s21  ;;  %p1580_p1 = scmp.ne.s32.totalorder %s2038_s22, %s1579_s14 }
 0x406   : > { %1106 = vst [vmem:[%s1941_s8 + $0x10] sm:$0xff] %v944_v35  ;;  %v1118_v31 = vmul.f32 %v944_v35, %v1770_v6  ;;  %s1652_s23 = smov [#allocation4]  }
 0x407   : > { %1123 = vst [vmem:[%s1941_s8 + $0x48] sm:$0xff] %v1119_v5  ;;  %p1581_p2 = pnand %p1580_p1, %p1731_p5  ;;  %s1583_s29 = sshll.u32 %s1652_s23, 4  ;;  %s1584_s29 = int_to_ptr.vmem [resolvable:$false] %s1583_s29 }
 0x408   : > { %1122 = vst [vmem:[%s1941_s8 + $0x20] sm:$0xff] %v1118_v31  ;;  %v1416_v34 = vpop.f32.mrb[6].mxu0  ;;  %s1585_s9 = scalar_lea.vmem %s1584_s29, 5120  ;;  %p1586_p4 = scmp.lt.s32.totalorder %s2038_s22, %s1584_s29 }
 0x409   : > { %1109 = vst [vmem:[%s1941_s8 + $0x88] sm:$0xff] %v1416_v34  ;;  %v1121_v36 = vmul.f32 %v1416_v34, %v1782_v15  ;;  %v954_v37 = vpop.f32.mrb[7].mxu0  ;;  %p1582_p3 = pneg %p1581_p2  ;;  %p1587_p7 = scmp.lt.s32.totalorder %s1585_s9, %s1579_s14 }
 0x40a   : > { %1108 = vst [vmem:[%s1941_s8 + $0x60] sm:$0xff] %v954_v37  ;;  %v1120_v9 = vmul.f32 %v954_v37, %v1777_v10 }
 0x40b   : > { %1125 = vst [vmem:[%s1941_s8 + $0x98] sm:$0xff] %v1121_v36  ;;  %p1588_p8 = por %p1587_p7, %p1586_p4 }
 0x40c   : > { %1124 = vst [vmem:[%s1941_s8 + $0x70] sm:$0xff] %v1120_v9 }
 0x40d   : > { %p1589_p9 = pnand %p1588_p8, %p1582_p3 }
 0x40f   : > { %1592 = shalt.err (!%p1589_p9)
}
 0x410   : > { %s1593_s8 = scalar_lea.hbm %s2036_s18, 2560  ;;  %s1597_s21 = scalar_lea.hbm %s2093_s7, 5120 }
 0x411   : > { %p1594_p10 = scmp.ne.s32.totalorder %s2036_s18, %s1593_s8  ;;  %p1598_p13 = scmp.lt.u32.totalorder %s2036_s18, %s2093_s7 }
 0x412   : > { %p1599_p0 = scmp.lt.u32.totalorder %s1597_s21, %s1593_s8  ;;  %p1601_p2 = scmp.lt.u32.totalorder %s1593_s8, %s2036_s18 }
 0x413   : > { %p1595_p11 = pnand %p1594_p10, %p1731_p5 }
 0x414   : > { %p1600_p1 = por %p1599_p0, %p1598_p13 }
 0x415   : > { %p1596_p12 = pneg %p1595_p11 }
 0x416   : > { %p1602_p3 = por %p1601_p2, %p1600_p1 }
 0x418   : > { %p1603_p4 = pnand %p1602_p3, %p1596_p12 }
 0x41a   : > { %1606 = shalt.err (!%p1603_p4)
}
 0x41b   : > { %1461 = dma.vmem_to_hbm [thread:$0]  (%p1731_p5), %s2038_s22, 2560, %s2036_s18, %s1132_s28, %s1650_s19, %s1650_s19, %s1651_s20  }
 0x41c PF: > { %p1471_p7 = scmp.ge.s32.totalorder %s1645_s27, 2  ;;  %s1176_s14 = sand.u32 1, %s1633_s24  }
 0x41d   : > { %s1177_s23 = scalar_lea.sflag [#allocation3], %s1176_s14 }
 0x41e   : > { %p1465_p8 = pnand %p1471_p7, %p1735_p6 }
 0x420   : > { %1624 = dma.done.wait (!%p1465_p8), %s1177_s23, 1280  }
 0x421   : > { %1626 = vsyncadd (!%p1465_p8), %s1177_s23, 4294966016  ;;  %s1186_s11 = scalar_lea.sflag [#allocation5], %s1176_s14 }
 0x422   : > { %1628 = dma.done.wait (!%p1465_p8), %s1186_s11, 2560  }
 0x423   : > { %1630 = vsyncadd (!%p1465_p8), %s1186_s11, 4294964736  ;;  %s2105_s13 = sld [smem:[#allocation8_spill]]  ;;  %p21_p5 = scmp.ge.s32.totalorder %s1718_s30, 4  }
 0x424   : > { %s2106_s24 = smov %s1637_s25  ;;  %s2107_s25 = smov %s1641_s26 }
 0x425   : > { %s2109_s27 = smov %s1718_s30  ;;  %23 = sbr.rel (!%p21_p5) target bundleno = 5 (0x5), region = 108 }
 0x429   : > { %s2108_s26 = smov %s2105_s13 }
 0x42c   :  { %1191 = vsyncpa [#allocation3], 1 }
 0x42d   :  { %1193 = vsyncpa [#allocation3 + $0x1], 1 }
 0x42e   :  { %1194 = vsyncpa [#allocation5], 1 }
 0x42f   :  { %1196 = vsyncpa [#allocation5 + $0x1], 1 }

</bundles_post_ra>
